<compile_context>
chip_gen: v7x
topology: tpu7x:2x2x1
jax: 0.10.0
libtpu: 0.0.40
codegen_flags: <defaults>
</compile_context>

<pallas_src>
import functools

import jax
import jax.numpy as jnp
from jax import lax
from jax.experimental import pallas as pl
from jax.experimental.pallas import tpu as pltpu


def _round_up(n, m):
    return ((n + m - 1) // m) * m


def encoder_kernel(x_ref, tab_ref, out_ref, *, num_embeddings):
    # x_ref:   (TB, F)        int32   -- batch tile of feature indices
    # tab_ref: (K_pad, D_pad) float32 -- all tables stacked row-wise (resident)
    # out_ref: (TB, D_pad)    float32
    TB, F = x_ref.shape
    K = tab_ref.shape[0]

    # Global row index into the stacked table: f * E + x[b, f].
    feat_off = lax.broadcasted_iota(jnp.int32, (TB, F), 1) * num_embeddings
    gidx = x_ref[...] + feat_off                                   # (TB, F)

    # Multi-hot over the stacked-table rows; features occupy disjoint row
    # ranges, so summing the per-feature one-hots is exact.
    iota_k = lax.broadcasted_iota(jnp.int32, (TB, K), 1)           # (TB, K)
    onehot = jnp.zeros((TB, K), jnp.float32)
    for f in range(F):  # static unroll; F is small
        onehot = onehot + (gidx[:, f:f + 1] == iota_k).astype(jnp.float32)

    # One MXU call does the gather AND the sum over features.
    out_ref[...] = jnp.dot(onehot, tab_ref[...],
                           preferred_element_type=jnp.float32)


def encoder_forward(x, tables):
    """x: (B, F) integer indices; tables: (F, E, D) float32. Returns (B, D) f32."""
    B, F = x.shape
    F2, E, D = tables.shape
    assert F2 == F
    K = F * E

    # Lane-dense padding: K (matmul contraction) and D (output lanes) -> x128.
    K_pad = _round_up(max(K, 128), 128)
    D_pad = _round_up(max(D, 128), 128)

    # Batch tiling: one tile for small B, 512-row tiles (parallel axis) otherwise.
    if B <= 512:
        TB = _round_up(max(B, 8), 8)
    else:
        TB = 512
    B_pad = _round_up(B, TB)

    tab_flat = tables.astype(jnp.float32).reshape(K, D)
    tab_flat = jnp.pad(tab_flat, ((0, K_pad - K), (0, D_pad - D)))
    x_pad = jnp.pad(x.astype(jnp.int32), ((0, B_pad - B), (0, 0)))

    kernel = functools.partial(encoder_kernel, num_embeddings=E)

    out = pl.pallas_call(
        kernel,
        out_shape=jax.ShapeDtypeStruct((B_pad, D_pad), jnp.float32),
        grid_spec=pltpu.PrefetchScalarGridSpec(
            num_scalar_prefetch=0,
            grid=(B_pad // TB,),
            in_specs=[
                pl.BlockSpec((TB, F), lambda i: (i, 0)),          # batch tile of indices
                pl.BlockSpec((K_pad, D_pad), lambda i: (0, 0)),   # stacked tables (resident)
            ],
            out_specs=pl.BlockSpec((TB, D_pad), lambda i: (i, 0)),
        ),
        compiler_params=pltpu.CompilerParams(
            dimension_semantics=("parallel",)),
    )(x_pad, tab_flat)

    return out[:B, :D]


if __name__ == "__main__":
    # Small shapes consistent with the module.
    B = 8    # batch
    F = 4    # num_feat
    E = 10   # num_embeddings (module default)
    D = 32   # embedding_dim

    key = jax.random.PRNGKey(0)
    k_idx, k_tab = jax.random.split(key)

    # torch.nn.Embedding default init is N(0, 1).
    tables = jax.random.normal(k_tab, (F, E, D), dtype=jnp.float32)
    x = jax.random.randint(k_idx, (B, F), 0, E, dtype=jnp.int32)

    out = encoder_forward(x, tables)
    out = jax.block_until_ready(out)

    # Pure-JAX reference: sum over features of per-feature table lookups.
    ref = jnp.zeros((B, D), jnp.float32)
    for d in range(F):
        ref = ref + tables[d][x[:, d]]

    assert out.shape == (B, D)
    assert jnp.allclose(out, ref, atol=1e-5, rtol=1e-5)

    print("KERNEL_OK")
</pallas_src>

<mosaic_0001>
module attributes {stable_mosaic.version = 11 : i64} {
  func.func @encoder_kernel(%arg0: i32, %arg1: memref<8x4xi32, #tpu.memory_space<vmem>>, %arg2: memref<128x128xf32, #tpu.memory_space<vmem>>, %arg3: memref<8x128xf32, #tpu.memory_space<vmem>>) attributes {dimension_semantics = [#tpu.dimension_semantics<parallel>], iteration_bounds = array<i64: 1>, scalar_prefetch = 0 : i64, scratch_operands = 0 : i64, tpu.core_type = #tpu.core_type<tc>, window_params = [{transform_indices = @transform_0, window_bounds = array<i64: 8, 4>}, {pipeline_mode = #tpu.pipeline_mode<synchronous>, transform_indices = @transform_1, window_bounds = array<i64: 128, 128>}, {transform_indices = @transform_2, window_bounds = array<i64: 8, 128>}]} {
    %0 = tpu.iota {dimensions = array<i32: 1>} : vector<8x4xi32>
    %c10_i32 = arith.constant 10 : i32
    %1 = vector.broadcast %c10_i32 : i32 to vector<8x4xi32>
    %2 = arith.muli %0, %1 : vector<8x4xi32>
    %c0 = arith.constant 0 : index
    %c0_0 = arith.constant 0 : index
    %3 = vector.load %arg1[%c0, %c0_0] : memref<8x4xi32, #tpu.memory_space<vmem>>, vector<8x4xi32>
    %4 = arith.addi %3, %2 : vector<8x4xi32>
    %5 = tpu.iota {dimensions = array<i32: 1>} : vector<8x128xi32>
    %cst = arith.constant 0.000000e+00 : f32
    %6 = vector.broadcast %cst : f32 to vector<8x128xf32>
    %7 = vector.extract_strided_slice %4 {offsets = [0, 0], sizes = [8, 1], strides = [1, 1]} : vector<8x4xi32> to vector<8x1xi32>
    %8 = vector.broadcast %7 : vector<8x1xi32> to vector<8x128xi32>
    %9 = arith.cmpi eq, %8, %5 : vector<8x128xi32>
    %10 = arith.extui %9 : vector<8x128xi1> to vector<8x128xi32>
    %11 = arith.sitofp %10 : vector<8x128xi32> to vector<8x128xf32>
    %12 = arith.addf %6, %11 : vector<8x128xf32>
    %13 = vector.extract_strided_slice %4 {offsets = [0, 1], sizes = [8, 1], strides = [1, 1]} : vector<8x4xi32> to vector<8x1xi32>
    %14 = vector.broadcast %13 : vector<8x1xi32> to vector<8x128xi32>
    %15 = arith.cmpi eq, %14, %5 : vector<8x128xi32>
    %16 = arith.extui %15 : vector<8x128xi1> to vector<8x128xi32>
    %17 = arith.sitofp %16 : vector<8x128xi32> to vector<8x128xf32>
    %18 = arith.addf %12, %17 : vector<8x128xf32>
    %19 = vector.extract_strided_slice %4 {offsets = [0, 2], sizes = [8, 1], strides = [1, 1]} : vector<8x4xi32> to vector<8x1xi32>
    %20 = vector.broadcast %19 : vector<8x1xi32> to vector<8x128xi32>
    %21 = arith.cmpi eq, %20, %5 : vector<8x128xi32>
    %22 = arith.extui %21 : vector<8x128xi1> to vector<8x128xi32>
    %23 = arith.sitofp %22 : vector<8x128xi32> to vector<8x128xf32>
    %24 = arith.addf %18, %23 : vector<8x128xf32>
    %25 = vector.extract_strided_slice %4 {offsets = [0, 3], sizes = [8, 1], strides = [1, 1]} : vector<8x4xi32> to vector<8x1xi32>
    %26 = vector.broadcast %25 : vector<8x1xi32> to vector<8x128xi32>
    %27 = arith.cmpi eq, %26, %5 : vector<8x128xi32>
    %28 = arith.extui %27 : vector<8x128xi1> to vector<8x128xi32>
    %29 = arith.sitofp %28 : vector<8x128xi32> to vector<8x128xf32>
    %30 = arith.addf %24, %29 : vector<8x128xf32>
    %c0_1 = arith.constant 0 : index
    %c0_2 = arith.constant 0 : index
    %31 = vector.load %arg2[%c0_1, %c0_2] : memref<128x128xf32, #tpu.memory_space<vmem>>, vector<128x128xf32>
    %cst_3 = arith.constant dense<0.000000e+00> : vector<8x128xf32>
    %32 = tpu.matmul %30, %31, %cst_3 {dimension_numbers = #tpu.dot_dimension_numbers<[1], [0], [0], [1], [0, 0, 1, 1], [], []>} : vector<8x128xf32>, vector<128x128xf32>, vector<8x128xf32> -> vector<8x128xf32>
    %c0_4 = arith.constant 0 : index
    %c0_5 = arith.constant 0 : index
    %33 = vector.load %arg3[%c0_4, %c0_5] : memref<8x128xf32, #tpu.memory_space<vmem>>, vector<8x128xf32>
    tpu.vector_store %arg3[%c0_4, %c0_5], %32 {strides = array<i32>} : memref<8x128xf32, #tpu.memory_space<vmem>>, vector<8x128xf32>,
    return
  }
  func.func @transform_0(%arg0: i32) -> (i32, i32) {
    %c0_i32 = arith.constant 0 : i32
    %c0_i32_0 = arith.constant 0 : i32
    return %arg0, %c0_i32 : i32, i32
  }
  func.func @transform_1(%arg0: i32) -> (i32, i32) {
    %c0_i32 = arith.constant 0 : i32
    %c0_i32_0 = arith.constant 0 : i32
    %c0_i32_1 = arith.constant 0 : i32
    return %c0_i32, %c0_i32_0 : i32, i32
  }
  func.func @transform_2(%arg0: i32) -> (i32, i32) {
    %c0_i32 = arith.constant 0 : i32
    %c0_i32_0 = arith.constant 0 : i32
    return %arg0, %c0_i32 : i32, i32
  }
}

</mosaic_0001>

<bundles_post_ra>
// kernel: tpu_custom_call.1
= control target key start
LH: loop header
LB: loop body
LE: loop exit
PB: predicated region body
PF: predicated region fallthrough
CT: control target
= control target key end

     0   :  { %7 = vsyncpa [#allocation3], 0  ;;  %s365_s0 = inlined_call_operand.vmem [shape: s32[8,4], index: 0, kind: input, shape index: {}]   ;;  %s366_s1 = inlined_call_operand.hbm [shape: f32[128,128], index: 1, kind: input, shape index: {}]   ;;  %s367_s2 = inlined_call_operand.hbm [shape: f32[8,128], index: 2, kind: output, shape index: {}]  }
   0x1   :  { %8 = vsyncpa [#allocation4], 0  ;;  %s305_s9 = smov [#allocation2]   ;;  %s257_s13 = scalar_lea.hbm %s366_s1, 2048 }
   0x2   :  { %s16_s10 = sshll.u32 %s305_s9, 4  ;;  %p258_p0 = scmp.ne.s32.totalorder %s366_s1, %s257_s13  ;;  %s17_s10 = int_to_ptr.vmem [resolvable:$true] %s16_s10 }
   0x3   :  { %p261_p1 = scmp.lt.u32.totalorder %s257_s13, %s366_s1 }
   0x5   :  { %p263_p2 = pnand %p261_p1, %p258_p0 }
   0x7   :  { %266 = shalt.err (!%p263_p2)
}
   0x8   :  { %s267_s18 = scalar_lea.vmem %s17_s10, 2048  ;;  %p272_p4 = scmp.lt.s32.totalorder %s17_s10, %s17_s10 }
   0x9   :  { %p268_p3 = scmp.ne.s32.totalorder %s17_s10, %s267_s18  ;;  %p273_p5 = scmp.lt.s32.totalorder %s267_s18, %s267_s18 }
   0xb   :  { %p274_p6 = por %p273_p5, %p272_p4 }
   0xd   :  { %p275_p7 = pnand %p274_p6, %p268_p3 }
   0xf   :  { %278 = shalt.err (!%p275_p7)
}
  0x10   :  { %s306_s19 = smov 128   ;;  %s307_s20 = smov 8  }
  0x11   :  { %22 = dma.hbm_to_vmem [thread:$0]  %s366_s1, 2048, %s17_s10, [#allocation3], %s306_s19, %s306_s19, %s307_s20  }
  0x12   :  { %301 = dma.done.wait [#allocation3], 2048  }
  0x13   :  { %302 = vsyncadd [#allocation3], 4294965248  ;;  %v26_v0 = vlaneseq  ;;  %v308_v1 = vmov 0   ;;  %v309_v2 = vmov 2   ;;  %v310_v4 = vmov 0.0|0.0   ;;  %v29_v6 = vld [vmem:[%s365_s0] sm:$0xff] }
  0x14   :  { %252 = vset.pattern.permute.xlu0 %v308_v1  ;;  %254 = vset.pattern.permute.xlu1 %v309_v2  ;;  %v59_v7 = vld [vmem:[#allocation2] sm:$0xff]  ;;  %v60_v8 = vld [vmem:[#allocation2 + $0x8] sm:$0xff]  ;;  %v61_v11 = vld [vmem:[#allocation2 + $0x10] sm:$0xff]  ;;  %v311_v16 = vmov 1   ;;  %v312_v17 = vmov 3   ;;  %vm313_vm0 = vmmov 0  }
  0x15   :  { %v343_v3 = vand.u32 127, %v26_v0  ;;  %217 = vmatprep.subr.bf16.mxu0 %v310_v4  ;;  %v218_v10 = vpack.c.bf16 %v60_v8, %v59_v7  ;;  %v62_v12 = vld [vmem:[#allocation2 + $0x18] sm:$0xff]  ;;  %v63_v14 = vld [vmem:[#allocation2 + $0x20] sm:$0xff]  ;;  %v64_v15 = vld [vmem:[#allocation2 + $0x28] sm:$0xff]  ;;  %v314_v24 = vmov 0.0   ;;  %s315_s0 = smov [#allocation5]  }
  0x16   :  { %v221_v13 = vpack.c.bf16 %v62_v12, %v61_v11  ;;  %v224_v18 = vpack.c.bf16 %v64_v15, %v63_v14  ;;  %v65_v19 = vld [vmem:[#allocation2 + $0x30] sm:$0xff]  ;;  %v66_v20 = vld [vmem:[#allocation2 + $0x38] sm:$0xff]  ;;  %v67_v22 = vld [vmem:[#allocation2 + $0x40] sm:$0xff]  ;;  %214 = vmatprep.mubr.msk.f32.mxu0 %vm313_vm0, %v314_v24  ;;  %s152_s1 = sshll.u32 %s315_s0, 4  ;;  %s153_s1 = int_to_ptr.vmem [resolvable:$true] %s152_s1 }
  0x17   :  { %v28_v5 = vmul.u32 10, %v343_v3  ;;  %219 = vmatpush3.bf16.msra.mxu0 %v218_v10  ;;  %v227_v21 = vpack.c.bf16 %v66_v20, %v65_v19  ;;  %v68_v23 = vld [vmem:[#allocation2 + $0x48] sm:$0xff]  ;;  %v69_v26 = vld [vmem:[#allocation2 + $0x50] sm:$0xff]  ;;  %v70_v27 = vld [vmem:[#allocation2 + $0x58] sm:$0xff]  ;;  %s279_s25 = scalar_lea.vmem %s153_s1, 128  ;;  %p284_p9 = scmp.lt.s32.totalorder %s153_s1, %s153_s1 }
  0x18   :  { %220 = vmatprep.subr.bf16.mxu0 %v310_v4  ;;  %v230_v25 = vpack.c.bf16 %v68_v23, %v67_v22  ;;  %v233_v28 = vpack.c.bf16 %v70_v27, %v69_v26  ;;  %v71_v29 = vld [vmem:[#allocation2 + $0x60] sm:$0xff]  ;;  %v72_v30 = vld [vmem:[#allocation2 + $0x68] sm:$0xff]  ;;  %v73_v32 = vld [vmem:[#allocation2 + $0x70] sm:$0xff]  ;;  %p280_p8 = scmp.ne.s32.totalorder %s153_s1, %s279_s25  ;;  %p285_p10 = scmp.lt.s32.totalorder %s279_s25, %s279_s25 }
  0x19   :  { %v30_v9 = vadd.s32 %v29_v6, %v28_v5  ;;  %v236_v31 = vpack.c.bf16 %v72_v30, %v71_v29  ;;  %v74_v33 = vld [vmem:[#allocation2 + $0x78] sm:$0xff] }
  0x1a   :  { %v239_v34 = vpack.c.bf16 %v74_v33, %v73_v32  ;;  %p286_p11 = por %p285_p10, %p284_p9 }
  0x1b   :  { %32 = vperm.xlu0 %252, %v30_v9   ;;  %46 = vperm.xlu1 %254, %v30_v9  }
  0x1c   :  { %222 = vmatpush3.bf16.msra.mxu0 %v221_v13  ;;  %p287_p12 = pnand %p286_p11, %p280_p8 }
  0x1d   :  { %223 = vmatprep.subr.bf16.mxu0 %v310_v4 }
  0x1f   :  { %253 = vset.pattern.permute.xlu0 %v311_v16  ;;  %255 = vset.pattern.permute.xlu1 %v312_v17 }
  0x20   :  { %39 = vperm.xlu0 %253, %v30_v9   ;;  %53 = vperm.xlu1 %255, %v30_v9  }
  0x21   :  { %225 = vmatpush3.bf16.msra.mxu0 %v224_v18 }
  0x22   :  { %226 = vmatprep.subr.bf16.mxu0 %v310_v4 }
  0x24   :  { %256 = vset.pattern.permute.xlu0 %v312_v17 }
  0x25   :  { %228 = vmatpush3.bf16.msra.mxu0 %v227_v21 }
  0x26   :  { %229 = vmatprep.subr.bf16.mxu0 %v310_v4 }
  0x29   :  { %231 = vmatpush3.bf16.msra.mxu0 %v230_v25 }
  0x2a   :  { %232 = vmatprep.subr.bf16.mxu0 %v310_v4 }
  0x2d   :  { %234 = vmatpush3.bf16.msra.mxu0 %v233_v28 }
  0x2e   :  { %235 = vmatprep.subr.bf16.mxu0 %v310_v4 }
  0x31   :  { %237 = vmatpush3.bf16.msra.mxu0 %v236_v31 }
  0x32   :  { %238 = vmatprep.subr.bf16.mxu0 %v310_v4 }
  0x35   :  { %240 = vmatpush3.bf16.msra.mxu0 %v239_v34 }
  0x9a   :  { %v33_v35 = vpop.permute.xlu0 %32  ;;  %v47_v36 = vpop.permute.xlu1 %46 }
  0x9b   :  { %vm34_vm1 = vcmp.eq.s32.totalorder %v33_v35, %v343_v3  ;;  %vm48_vm2 = vcmp.eq.s32.totalorder %v47_v36, %v343_v3 }
  0x9c   :  { %v161_v39 = vsel %vm34_vm1, 1.0, %v314_v24  ;;  %v163_v42 = vsel %vm48_vm2, 1.0, %v314_v24 }
  0x9f   :  { %v40_v37 = vpop.permute.xlu0 %39  ;;  %v54_v38 = vpop.permute.xlu1 %53 }
  0xa0   :  { %vm41_vm3 = vcmp.eq.s32.totalorder %v40_v37, %v343_v3  ;;  %vm55_vm4 = vcmp.eq.s32.totalorder %v54_v38, %v343_v3 }
  0xa1   :  { %v162_v40 = vsel %vm41_vm3, 1.0, %v314_v24  ;;  %v164_v43 = vsel %vm55_vm4, 1.0, %v314_v24 }
  0xa2   :  { %v44_v41 = vadd.f32 %v162_v40, %v161_v39 }
  0xa4   :  { %v51_v44 = vadd.f32 %v163_v42, %v44_v41 }
  0xa6   :  { %v58_v45 = vadd.f32 %v164_v43, %v51_v44 }
  0xa8   :  { %215 = vmatmul.mubr.f32.vlgmr.msra.gmra.mrb[0].mxu0 %v58_v45 }
 0x17b   :  { %v141_v46 = vpop.f32.mrb[0].mxu0 }
 0x17c   :  { %145 = vst [vmem:[#allocation5] sm:$0xff] %v141_v46  ;;  %v216_v47 = vpop.f32.mrb[1].mxu0 }
 0x17d   :  { %290 = shalt.err (!%p287_p12)
}
 0x17e   :  { %s291_s28 = scalar_lea.hbm %s367_s2, 128 }
 0x17f   :  { %p292_p13 = scmp.ne.s32.totalorder %s367_s2, %s291_s28  ;;  %p295_p0 = scmp.lt.u32.totalorder %s291_s28, %s367_s2 }
 0x181   :  { %p297_p1 = pnand %p295_p0, %p292_p13 }
 0x183   :  { %300 = shalt.err (!%p297_p1)
}
 0x184   :  { %155 = dma.vmem_to_hbm [thread:$0]  %s153_s1, 128, %s367_s2, [#allocation4]  }
 0x185   :  { %303 = dma.done.wait [#allocation4], 128  }
 0x186   :  { %304 = vsyncadd [#allocation4], 4294967168 }
 0x187   :  { %159 = vsyncpa [#allocation3], 1 }
 0x188   :  { %160 = vsyncpa [#allocation4], 1 }

</bundles_post_ra>
